<compile_context>
chip_gen: v7x
topology: tpu7x:2x2x1
jax: 0.10.0
libtpu: 0.0.40
codegen_flags: <defaults>
</compile_context>

<pallas_src>
import functools

import jax
import jax.numpy as jnp
from jax.experimental import pallas as pl
from jax.experimental.pallas import tpu as pltpu

LEAKY_SLOPE = 0.2
BN_EPS = 1e-5
LANE = 128  # lane width used for the (padded) intermediate feature dims


def _fused_ae_kernel(x_ref, w0_ref, w1_ref, w2_ref, w3_ref,
                     b_ref, g_ref, bt_ref, o_ref):
    """Entire autoencoder forward in one body; activations stay vreg/VMEM-resident."""
    n = x_ref.shape[0]
    inv_n = 1.0 / n
    w_refs = (w0_ref, w1_ref, w2_ref, w3_ref)

    h = x_ref[...]                                   # (n, d_in0) f32, true width
    for i, w_ref in enumerate(w_refs):               # static unroll over 4 layers
        k = w_ref.shape[0]                           # true contraction width (8..32)
        lhs = h if h.shape[1] == k else h[:, :k]     # drop padded lanes before the dot
        # Linear on the MXU: bf16 operands, f32 accumulate, + bias.
        h = jnp.dot(lhs.astype(jnp.bfloat16), w_ref[...],
                    preferred_element_type=jnp.float32) + b_ref[i]
        # LeakyReLU(0.2) as a single vmax.
        h = jnp.maximum(h, LEAKY_SLOPE * h)
        # BatchNorm1d (training-mode stats): one-pass sums in f32, folded affine.
        mean = jnp.sum(h, axis=0, keepdims=True) * inv_n
        ex2 = jnp.sum(h * h, axis=0, keepdims=True) * inv_n
        var = jnp.maximum(ex2 - mean * mean, 0.0)
        scale = g_ref[i] * jax.lax.rsqrt(var + BN_EPS)   # rsqrt -> EUP slot
        shift = bt_ref[i] - mean * scale                 # (1,128) row math, cheap
        h = h * scale + shift                            # 2 VPU ops per element
    # True-width store (tiny masked vst) -- no wrapper-side slice needed.
    o_ref[...] = h[:, :o_ref.shape[1]].astype(o_ref.dtype)


def _pad_cols(a, width):
    return jnp.pad(a, ((0, 0), (0, width - a.shape[1])))


def prepare_params(params):
    """Lane-pad only the output dim of each layer; weights in bf16.

    Weights are kept per-layer (d_in, 128) bf16 so the MXU contraction runs at
    the true K and total weight DMA is ~22 KiB.  Bias / gamma / beta are stacked
    (L, 1, 128) f32; padded lanes are exactly zero, so padded columns stay zero
    through every layer.
    """
    ws, bs, gs, bts = [], [], [], []
    for (w, b, gamma, beta) in params:
        ws.append(_pad_cols(w, LANE).astype(jnp.bfloat16))
        bs.append(_pad_cols(b, LANE))
        gs.append(_pad_cols(gamma, LANE))
        bts.append(_pad_cols(beta, LANE))
    return (tuple(ws), jnp.stack(bs), jnp.stack(gs), jnp.stack(bts))


@functools.partial(jax.jit, static_argnames=("d_out",))
def autoencoder_forward(x, prepared, *, d_out):
    """Single fused pallas_call for the whole forward pass (x at true width)."""
    ws, b_all, g_all, bt_all = prepared
    n = x.shape[0]
    n_layers = len(ws)

    k_total = sum(int(w.shape[0]) for w in ws)
    cost = pl.CostEstimate(
        flops=2 * n * LANE * k_total,
        transcendentals=n_layers * LANE,               # rsqrt per feature per layer
        bytes_accessed=(x.size * x.dtype.itemsize
                        + sum(w.size * w.dtype.itemsize for w in ws)
                        + 4 * (b_all.size + g_all.size + bt_all.size)
                        + 4 * n * d_out),
    )

    def full(shape):
        # Full-array block (exempt from the (8,128) divisibility rule).
        return pl.BlockSpec(shape, lambda: (0,) * len(shape))

    return pl.pallas_call(
        _fused_ae_kernel,
        out_shape=jax.ShapeDtypeStruct((n, d_out), jnp.float32),
        grid=(),
        in_specs=[full(x.shape)]
                 + [full(w.shape) for w in ws]
                 + [full(b_all.shape), full(g_all.shape), full(bt_all.shape)],
        out_specs=full((n, d_out)),
        compiler_params=pltpu.CompilerParams(vmem_limit_bytes=32 * 1024 * 1024),
        cost_estimate=cost,
    )(x, *ws, b_all, g_all, bt_all)


def init_autoencoder_params(key, enlyr, delyr):
    """Deterministic parameter init mirroring the module's layer shapes."""
    assert enlyr[0] == delyr[-1] and enlyr[-1] == delyr[0]
    assert len(enlyr) > 1 and len(delyr) > 1
    params = []
    dims = list(zip(enlyr[:-1], enlyr[1:])) + list(zip(delyr[:-1], delyr[1:]))
    for (d_in, d_out) in dims:
        key, kw, kb, kg, kbe = jax.random.split(key, 5)
        bound = 1.0 / jnp.sqrt(d_in)
        w = jax.random.uniform(kw, (d_in, d_out), jnp.float32, -bound, bound)
        b = jax.random.uniform(kb, (1, d_out), jnp.float32, -bound, bound)
        gamma = jnp.ones((1, d_out), jnp.float32) + 0.01 * jax.random.normal(kg, (1, d_out))
        beta = 0.01 * jax.random.normal(kbe, (1, d_out), dtype=jnp.float32)
        params.append((w, b, gamma, beta))
    return params


def reference_forward(x, params, matmul_dtype=jnp.float32):
    """Pure-JAX reference (two-pass variance).

    matmul_dtype=jnp.bfloat16 emulates the kernel's bf16 MXU operands so the
    kernel math can be checked tightly; f32 gives the PyTorch-module semantics.
    """
    h = x
    for (w, b, gamma, beta) in params:
        y = jnp.dot(h.astype(matmul_dtype), w.astype(matmul_dtype),
                    preferred_element_type=jnp.float32) + b
        y = jnp.where(y > 0, y, LEAKY_SLOPE * y)
        mean = jnp.mean(y, axis=0, keepdims=True)
        var = jnp.mean((y - mean) ** 2, axis=0, keepdims=True)
        h = gamma * (y - mean) / jnp.sqrt(var + BN_EPS) + beta
    return h


if __name__ == "__main__":
    enlyr = [16, 32, 8]          # encoder layer widths
    delyr = [8, 32, 16]          # decoder layer widths (mirror)
    batch = 8                    # sublane-aligned small batch

    key = jax.random.PRNGKey(0)
    key, kx = jax.random.split(key)
    x = jax.random.normal(kx, (batch, enlyr[0]), dtype=jnp.float32)
    params = init_autoencoder_params(key, enlyr, delyr)
    prepared = prepare_params(params)

    out = autoencoder_forward(x, prepared, d_out=delyr[-1])
    out = jax.block_until_ready(out)
    assert out.shape == (batch, delyr[-1])

    # Tight check: same bf16 matmul operands as the kernel (validates kernel math).
    ref_bf16 = reference_forward(x, params, matmul_dtype=jnp.bfloat16)
    assert jnp.allclose(out, ref_bf16, atol=1e-2, rtol=1e-2), \
        float(jnp.max(jnp.abs(out - ref_bf16)))
    # Sanity check against the full-f32 PyTorch-semantics reference.
    ref_f32 = reference_forward(x, params)
    assert jnp.allclose(out, ref_f32, atol=1e-1, rtol=1e-1), \
        float(jnp.max(jnp.abs(out - ref_f32)))

    print("KERNEL_OK")
</pallas_src>

<mosaic_0001>
module attributes {stable_mosaic.version = 11 : i64} {
  func.func @_fused_ae_kernel(%arg0: memref<8x16xf32, #tpu.memory_space<vmem>>, %arg1: memref<16x128xbf16, #tpu.memory_space<vmem>>, %arg2: memref<32x128xbf16, #tpu.memory_space<vmem>>, %arg3: memref<8x128xbf16, #tpu.memory_space<vmem>>, %arg4: memref<32x128xbf16, #tpu.memory_space<vmem>>, %arg5: memref<4x1x128xf32, #tpu.memory_space<vmem>>, %arg6: memref<4x1x128xf32, #tpu.memory_space<vmem>>, %arg7: memref<4x1x128xf32, #tpu.memory_space<vmem>>, %arg8: memref<8x16xf32, #tpu.memory_space<vmem>>) attributes {dimension_semantics = [], scalar_prefetch = 0 : i64, scratch_operands = 0 : i64, tpu.core_type = #tpu.core_type<tc>} {
    %c0 = arith.constant 0 : index
    %c0_0 = arith.constant 0 : index
    %0 = vector.load %arg0[%c0, %c0_0] : memref<8x16xf32, #tpu.memory_space<vmem>>, vector<8x16xf32>
    %1 = arith.truncf %0 : vector<8x16xf32> to vector<8x16xbf16>
    %c0_1 = arith.constant 0 : index
    %c0_2 = arith.constant 0 : index
    %2 = vector.load %arg1[%c0_1, %c0_2] : memref<16x128xbf16, #tpu.memory_space<vmem>>, vector<16x128xbf16>
    %cst = arith.constant dense<0.000000e+00> : vector<8x128xf32>
    %3 = tpu.matmul %1, %2, %cst {dimension_numbers = #tpu.dot_dimension_numbers<[1], [0], [0], [1], [0, 0, 1, 1], [], []>} : vector<8x16xbf16>, vector<16x128xbf16>, vector<8x128xf32> -> vector<8x128xf32>
    %c0_3 = arith.constant 0 : index
    %c0_4 = arith.constant 0 : index
    %c0_5 = arith.constant 0 : index
    %4 = vector.load %arg5[%c0_3, %c0_4, %c0_5] : memref<4x1x128xf32, #tpu.memory_space<vmem>>, vector<1x1x128xf32>
    %5 = vector.shape_cast %4 : vector<1x1x128xf32> to vector<1x128xf32>
    %6 = vector.broadcast %5 : vector<1x128xf32> to vector<8x128xf32>
    %7 = arith.addf %3, %6 : vector<8x128xf32>
    %cst_6 = arith.constant 2.000000e-01 : f32
    %8 = vector.broadcast %cst_6 : f32 to vector<8x128xf32>
    %9 = arith.mulf %8, %7 : vector<8x128xf32>
    %10 = arith.maximumf %7, %9 : vector<8x128xf32>
    %cst_7 = arith.constant dense<0.000000e+00> : vector<128xf32>
    %11 = vector.multi_reduction <add>, %10, %cst_7 [0] : vector<8x128xf32> to vector<128xf32>
    %12 = vector.shape_cast %11 : vector<128xf32> to vector<1x128xf32>
    %cst_8 = arith.constant 1.250000e-01 : f32
    %13 = vector.broadcast %cst_8 : f32 to vector<1x128xf32>
    %14 = arith.mulf %12, %13 : vector<1x128xf32>
    %15 = arith.mulf %10, %10 : vector<8x128xf32>
    %cst_9 = arith.constant dense<0.000000e+00> : vector<128xf32>
    %16 = vector.multi_reduction <add>, %15, %cst_9 [0] : vector<8x128xf32> to vector<128xf32>
    %17 = vector.shape_cast %16 : vector<128xf32> to vector<1x128xf32>
    %cst_10 = arith.constant 1.250000e-01 : f32
    %18 = vector.broadcast %cst_10 : f32 to vector<1x128xf32>
    %19 = arith.mulf %17, %18 : vector<1x128xf32>
    %20 = arith.mulf %14, %14 : vector<1x128xf32>
    %21 = arith.subf %19, %20 : vector<1x128xf32>
    %cst_11 = arith.constant 0.000000e+00 : f32
    %22 = vector.broadcast %cst_11 : f32 to vector<1x128xf32>
    %23 = arith.maximumf %21, %22 : vector<1x128xf32>
    %c0_12 = arith.constant 0 : index
    %c0_13 = arith.constant 0 : index
    %c0_14 = arith.constant 0 : index
    %24 = vector.load %arg6[%c0_12, %c0_13, %c0_14] : memref<4x1x128xf32, #tpu.memory_space<vmem>>, vector<1x1x128xf32>
    %25 = vector.shape_cast %24 : vector<1x1x128xf32> to vector<1x128xf32>
    %cst_15 = arith.constant 9.99999974E-6 : f32
    %26 = vector.broadcast %cst_15 : f32 to vector<1x128xf32>
    %27 = arith.addf %23, %26 : vector<1x128xf32>
    %28 = math.rsqrt %27 : vector<1x128xf32>
    %29 = arith.mulf %25, %28 : vector<1x128xf32>
    %c0_16 = arith.constant 0 : index
    %c0_17 = arith.constant 0 : index
    %c0_18 = arith.constant 0 : index
    %30 = vector.load %arg7[%c0_16, %c0_17, %c0_18] : memref<4x1x128xf32, #tpu.memory_space<vmem>>, vector<1x1x128xf32>
    %31 = vector.shape_cast %30 : vector<1x1x128xf32> to vector<1x128xf32>
    %32 = arith.mulf %14, %29 : vector<1x128xf32>
    %33 = arith.subf %31, %32 : vector<1x128xf32>
    %34 = vector.broadcast %29 : vector<1x128xf32> to vector<8x128xf32>
    %35 = arith.mulf %10, %34 : vector<8x128xf32>
    %36 = vector.broadcast %33 : vector<1x128xf32> to vector<8x128xf32>
    %37 = arith.addf %35, %36 : vector<8x128xf32>
    %38 = vector.extract_strided_slice %37 {offsets = [0, 0], sizes = [8, 32], strides = [1, 1]} : vector<8x128xf32> to vector<8x32xf32>
    %39 = arith.truncf %38 : vector<8x32xf32> to vector<8x32xbf16>
    %c0_19 = arith.constant 0 : index
    %c0_20 = arith.constant 0 : index
    %40 = vector.load %arg2[%c0_19, %c0_20] : memref<32x128xbf16, #tpu.memory_space<vmem>>, vector<32x128xbf16>
    %cst_21 = arith.constant dense<0.000000e+00> : vector<8x128xf32>
    %41 = tpu.matmul %39, %40, %cst_21 {dimension_numbers = #tpu.dot_dimension_numbers<[1], [0], [0], [1], [0, 0, 1, 1], [], []>} : vector<8x32xbf16>, vector<32x128xbf16>, vector<8x128xf32> -> vector<8x128xf32>
    %c1 = arith.constant 1 : index
    %c0_22 = arith.constant 0 : index
    %c0_23 = arith.constant 0 : index
    %42 = vector.load %arg5[%c1, %c0_22, %c0_23] : memref<4x1x128xf32, #tpu.memory_space<vmem>>, vector<1x1x128xf32>
    %43 = vector.shape_cast %42 : vector<1x1x128xf32> to vector<1x128xf32>
    %44 = vector.broadcast %43 : vector<1x128xf32> to vector<8x128xf32>
    %45 = arith.addf %41, %44 : vector<8x128xf32>
    %cst_24 = arith.constant 2.000000e-01 : f32
    %46 = vector.broadcast %cst_24 : f32 to vector<8x128xf32>
    %47 = arith.mulf %46, %45 : vector<8x128xf32>
    %48 = arith.maximumf %45, %47 : vector<8x128xf32>
    %cst_25 = arith.constant dense<0.000000e+00> : vector<128xf32>
    %49 = vector.multi_reduction <add>, %48, %cst_25 [0] : vector<8x128xf32> to vector<128xf32>
    %50 = vector.shape_cast %49 : vector<128xf32> to vector<1x128xf32>
    %cst_26 = arith.constant 1.250000e-01 : f32
    %51 = vector.broadcast %cst_26 : f32 to vector<1x128xf32>
    %52 = arith.mulf %50, %51 : vector<1x128xf32>
    %53 = arith.mulf %48, %48 : vector<8x128xf32>
    %cst_27 = arith.constant dense<0.000000e+00> : vector<128xf32>
    %54 = vector.multi_reduction <add>, %53, %cst_27 [0] : vector<8x128xf32> to vector<128xf32>
    %55 = vector.shape_cast %54 : vector<128xf32> to vector<1x128xf32>
    %cst_28 = arith.constant 1.250000e-01 : f32
    %56 = vector.broadcast %cst_28 : f32 to vector<1x128xf32>
    %57 = arith.mulf %55, %56 : vector<1x128xf32>
    %58 = arith.mulf %52, %52 : vector<1x128xf32>
    %59 = arith.subf %57, %58 : vector<1x128xf32>
    %cst_29 = arith.constant 0.000000e+00 : f32
    %60 = vector.broadcast %cst_29 : f32 to vector<1x128xf32>
    %61 = arith.maximumf %59, %60 : vector<1x128xf32>
    %c1_30 = arith.constant 1 : index
    %c0_31 = arith.constant 0 : index
    %c0_32 = arith.constant 0 : index
    %62 = vector.load %arg6[%c1_30, %c0_31, %c0_32] : memref<4x1x128xf32, #tpu.memory_space<vmem>>, vector<1x1x128xf32>
    %63 = vector.shape_cast %62 : vector<1x1x128xf32> to vector<1x128xf32>
    %cst_33 = arith.constant 9.99999974E-6 : f32
    %64 = vector.broadcast %cst_33 : f32 to vector<1x128xf32>
    %65 = arith.addf %61, %64 : vector<1x128xf32>
    %66 = math.rsqrt %65 : vector<1x128xf32>
    %67 = arith.mulf %63, %66 : vector<1x128xf32>
    %c1_34 = arith.constant 1 : index
    %c0_35 = arith.constant 0 : index
    %c0_36 = arith.constant 0 : index
    %68 = vector.load %arg7[%c1_34, %c0_35, %c0_36] : memref<4x1x128xf32, #tpu.memory_space<vmem>>, vector<1x1x128xf32>
    %69 = vector.shape_cast %68 : vector<1x1x128xf32> to vector<1x128xf32>
    %70 = arith.mulf %52, %67 : vector<1x128xf32>
    %71 = arith.subf %69, %70 : vector<1x128xf32>
    %72 = vector.broadcast %67 : vector<1x128xf32> to vector<8x128xf32>
    %73 = arith.mulf %48, %72 : vector<8x128xf32>
    %74 = vector.broadcast %71 : vector<1x128xf32> to vector<8x128xf32>
    %75 = arith.addf %73, %74 : vector<8x128xf32>
    %76 = vector.extract_strided_slice %75 {offsets = [0, 0], sizes = [8, 8], strides = [1, 1]} : vector<8x128xf32> to vector<8x8xf32>
    %77 = arith.truncf %76 : vector<8x8xf32> to vector<8x8xbf16>
    %c0_37 = arith.constant 0 : index
    %c0_38 = arith.constant 0 : index
    %78 = vector.load %arg3[%c0_37, %c0_38] : memref<8x128xbf16, #tpu.memory_space<vmem>>, vector<8x128xbf16>
    %cst_39 = arith.constant dense<0.000000e+00> : vector<8x128xf32>
    %79 = tpu.matmul %77, %78, %cst_39 {dimension_numbers = #tpu.dot_dimension_numbers<[1], [0], [0], [1], [0, 0, 1, 1], [], []>} : vector<8x8xbf16>, vector<8x128xbf16>, vector<8x128xf32> -> vector<8x128xf32>
    %c2 = arith.constant 2 : index
    %c0_40 = arith.constant 0 : index
    %c0_41 = arith.constant 0 : index
    %80 = vector.load %arg5[%c2, %c0_40, %c0_41] : memref<4x1x128xf32, #tpu.memory_space<vmem>>, vector<1x1x128xf32>
    %81 = vector.shape_cast %80 : vector<1x1x128xf32> to vector<1x128xf32>
    %82 = vector.broadcast %81 : vector<1x128xf32> to vector<8x128xf32>
    %83 = arith.addf %79, %82 : vector<8x128xf32>
    %cst_42 = arith.constant 2.000000e-01 : f32
    %84 = vector.broadcast %cst_42 : f32 to vector<8x128xf32>
    %85 = arith.mulf %84, %83 : vector<8x128xf32>
    %86 = arith.maximumf %83, %85 : vector<8x128xf32>
    %cst_43 = arith.constant dense<0.000000e+00> : vector<128xf32>
    %87 = vector.multi_reduction <add>, %86, %cst_43 [0] : vector<8x128xf32> to vector<128xf32>
    %88 = vector.shape_cast %87 : vector<128xf32> to vector<1x128xf32>
    %cst_44 = arith.constant 1.250000e-01 : f32
    %89 = vector.broadcast %cst_44 : f32 to vector<1x128xf32>
    %90 = arith.mulf %88, %89 : vector<1x128xf32>
    %91 = arith.mulf %86, %86 : vector<8x128xf32>
    %cst_45 = arith.constant dense<0.000000e+00> : vector<128xf32>
    %92 = vector.multi_reduction <add>, %91, %cst_45 [0] : vector<8x128xf32> to vector<128xf32>
    %93 = vector.shape_cast %92 : vector<128xf32> to vector<1x128xf32>
    %cst_46 = arith.constant 1.250000e-01 : f32
    %94 = vector.broadcast %cst_46 : f32 to vector<1x128xf32>
    %95 = arith.mulf %93, %94 : vector<1x128xf32>
    %96 = arith.mulf %90, %90 : vector<1x128xf32>
    %97 = arith.subf %95, %96 : vector<1x128xf32>
    %cst_47 = arith.constant 0.000000e+00 : f32
    %98 = vector.broadcast %cst_47 : f32 to vector<1x128xf32>
    %99 = arith.maximumf %97, %98 : vector<1x128xf32>
    %c2_48 = arith.constant 2 : index
    %c0_49 = arith.constant 0 : index
    %c0_50 = arith.constant 0 : index
    %100 = vector.load %arg6[%c2_48, %c0_49, %c0_50] : memref<4x1x128xf32, #tpu.memory_space<vmem>>, vector<1x1x128xf32>
    %101 = vector.shape_cast %100 : vector<1x1x128xf32> to vector<1x128xf32>
    %cst_51 = arith.constant 9.99999974E-6 : f32
    %102 = vector.broadcast %cst_51 : f32 to vector<1x128xf32>
    %103 = arith.addf %99, %102 : vector<1x128xf32>
    %104 = math.rsqrt %103 : vector<1x128xf32>
    %105 = arith.mulf %101, %104 : vector<1x128xf32>
    %c2_52 = arith.constant 2 : index
    %c0_53 = arith.constant 0 : index
    %c0_54 = arith.constant 0 : index
    %106 = vector.load %arg7[%c2_52, %c0_53, %c0_54] : memref<4x1x128xf32, #tpu.memory_space<vmem>>, vector<1x1x128xf32>
    %107 = vector.shape_cast %106 : vector<1x1x128xf32> to vector<1x128xf32>
    %108 = arith.mulf %90, %105 : vector<1x128xf32>
    %109 = arith.subf %107, %108 : vector<1x128xf32>
    %110 = vector.broadcast %105 : vector<1x128xf32> to vector<8x128xf32>
    %111 = arith.mulf %86, %110 : vector<8x128xf32>
    %112 = vector.broadcast %109 : vector<1x128xf32> to vector<8x128xf32>
    %113 = arith.addf %111, %112 : vector<8x128xf32>
    %114 = vector.extract_strided_slice %113 {offsets = [0, 0], sizes = [8, 32], strides = [1, 1]} : vector<8x128xf32> to vector<8x32xf32>
    %115 = arith.truncf %114 : vector<8x32xf32> to vector<8x32xbf16>
    %c0_55 = arith.constant 0 : index
    %c0_56 = arith.constant 0 : index
    %116 = vector.load %arg4[%c0_55, %c0_56] : memref<32x128xbf16, #tpu.memory_space<vmem>>, vector<32x128xbf16>
    %cst_57 = arith.constant dense<0.000000e+00> : vector<8x128xf32>
    %117 = tpu.matmul %115, %116, %cst_57 {dimension_numbers = #tpu.dot_dimension_numbers<[1], [0], [0], [1], [0, 0, 1, 1], [], []>} : vector<8x32xbf16>, vector<32x128xbf16>, vector<8x128xf32> -> vector<8x128xf32>
    %c3 = arith.constant 3 : index
    %c0_58 = arith.constant 0 : index
    %c0_59 = arith.constant 0 : index
    %118 = vector.load %arg5[%c3, %c0_58, %c0_59] : memref<4x1x128xf32, #tpu.memory_space<vmem>>, vector<1x1x128xf32>
    %119 = vector.shape_cast %118 : vector<1x1x128xf32> to vector<1x128xf32>
    %120 = vector.broadcast %119 : vector<1x128xf32> to vector<8x128xf32>
    %121 = arith.addf %117, %120 : vector<8x128xf32>
    %cst_60 = arith.constant 2.000000e-01 : f32
    %122 = vector.broadcast %cst_60 : f32 to vector<8x128xf32>
    %123 = arith.mulf %122, %121 : vector<8x128xf32>
    %124 = arith.maximumf %121, %123 : vector<8x128xf32>
    %cst_61 = arith.constant dense<0.000000e+00> : vector<128xf32>
    %125 = vector.multi_reduction <add>, %124, %cst_61 [0] : vector<8x128xf32> to vector<128xf32>
    %126 = vector.shape_cast %125 : vector<128xf32> to vector<1x128xf32>
    %cst_62 = arith.constant 1.250000e-01 : f32
    %127 = vector.broadcast %cst_62 : f32 to vector<1x128xf32>
    %128 = arith.mulf %126, %127 : vector<1x128xf32>
    %129 = arith.mulf %124, %124 : vector<8x128xf32>
    %cst_63 = arith.constant dense<0.000000e+00> : vector<128xf32>
    %130 = vector.multi_reduction <add>, %129, %cst_63 [0] : vector<8x128xf32> to vector<128xf32>
    %131 = vector.shape_cast %130 : vector<128xf32> to vector<1x128xf32>
    %cst_64 = arith.constant 1.250000e-01 : f32
    %132 = vector.broadcast %cst_64 : f32 to vector<1x128xf32>
    %133 = arith.mulf %131, %132 : vector<1x128xf32>
    %134 = arith.mulf %128, %128 : vector<1x128xf32>
    %135 = arith.subf %133, %134 : vector<1x128xf32>
    %cst_65 = arith.constant 0.000000e+00 : f32
    %136 = vector.broadcast %cst_65 : f32 to vector<1x128xf32>
    %137 = arith.maximumf %135, %136 : vector<1x128xf32>
    %c3_66 = arith.constant 3 : index
    %c0_67 = arith.constant 0 : index
    %c0_68 = arith.constant 0 : index
    %138 = vector.load %arg6[%c3_66, %c0_67, %c0_68] : memref<4x1x128xf32, #tpu.memory_space<vmem>>, vector<1x1x128xf32>
    %139 = vector.shape_cast %138 : vector<1x1x128xf32> to vector<1x128xf32>
    %cst_69 = arith.constant 9.99999974E-6 : f32
    %140 = vector.broadcast %cst_69 : f32 to vector<1x128xf32>
    %141 = arith.addf %137, %140 : vector<1x128xf32>
    %142 = math.rsqrt %141 : vector<1x128xf32>
    %143 = arith.mulf %139, %142 : vector<1x128xf32>
    %c3_70 = arith.constant 3 : index
    %c0_71 = arith.constant 0 : index
    %c0_72 = arith.constant 0 : index
    %144 = vector.load %arg7[%c3_70, %c0_71, %c0_72] : memref<4x1x128xf32, #tpu.memory_space<vmem>>, vector<1x1x128xf32>
    %145 = vector.shape_cast %144 : vector<1x1x128xf32> to vector<1x128xf32>
    %146 = arith.mulf %128, %143 : vector<1x128xf32>
    %147 = arith.subf %145, %146 : vector<1x128xf32>
    %148 = vector.broadcast %143 : vector<1x128xf32> to vector<8x128xf32>
    %149 = arith.mulf %124, %148 : vector<8x128xf32>
    %150 = vector.broadcast %147 : vector<1x128xf32> to vector<8x128xf32>
    %151 = arith.addf %149, %150 : vector<8x128xf32>
    %152 = vector.extract_strided_slice %151 {offsets = [0, 0], sizes = [8, 16], strides = [1, 1]} : vector<8x128xf32> to vector<8x16xf32>
    %c0_73 = arith.constant 0 : index
    %c0_74 = arith.constant 0 : index
    %153 = vector.load %arg8[%c0_73, %c0_74] : memref<8x16xf32, #tpu.memory_space<vmem>>, vector<8x16xf32>
    tpu.vector_store %arg8[%c0_73, %c0_74], %152 {strides = array<i32>} : memref<8x16xf32, #tpu.memory_space<vmem>>, vector<8x16xf32>,
    return
  }
}

</mosaic_0001>

<bundles_post_ra>
// kernel: autoencoder_forward.1
= control target key start
LH: loop header
LB: loop body
LE: loop exit
PB: predicated region body
PF: predicated region fallthrough
CT: control target
= control target key end

     0   :  { %13 = vsyncpa [#allocation3], 0  ;;  %s918_s0 = inlined_call_operand.hbm [shape: f32[8,16], index: 0, kind: input, shape index: {}]   ;;  %s919_s1 = inlined_call_operand.hbm [shape: bf16[16,128], index: 1, kind: input, shape index: {}]   ;;  %s920_s2 = inlined_call_operand.hbm [shape: bf16[32,128], index: 2, kind: input, shape index: {}]   ;;  %s921_s3 = inlined_call_operand.vmem [shape: bf16[8,128], index: 3, kind: input, shape index: {}]   ;;  %s922_s4 = inlined_call_operand.hbm [shape: bf16[32,128], index: 4, kind: input, shape index: {}]   ;;  %s923_s5 = inlined_call_operand.vmem [shape: f32[4,1,128], index: 5, kind: input, shape index: {}]   ;;  %s924_s6 = inlined_call_operand.vmem [shape: f32[4,1,128], index: 6, kind: input, shape index: {}]   ;;  %s925_s7 = inlined_call_operand.vmem [shape: f32[4,1,128], index: 7, kind: input, shape index: {}]   ;;  %s926_s8 = inlined_call_operand.hbm [shape: f32[8,16], index: 8, kind: output, shape index: {}]  }
   0x1   :  { %14 = vsyncpa [#allocation6], 0 }
   0x2   :  { %15 = vsyncpa [#allocation9], 0 }
   0x3   :  { %16 = vsyncpa [#allocation4], 0  ;;  %s728_s27 = smov [#allocation5]   ;;  %s610_s9 = scalar_lea.hbm %s919_s1, 128 }
   0x4   :  { %s32_s28 = sshll.u32 %s728_s27, 4  ;;  %p611_p0 = scmp.ne.s32.totalorder %s919_s1, %s610_s9  ;;  %s33_s28 = int_to_ptr.vmem [resolvable:$true] %s32_s28 }
   0x5   :  { %p614_p1 = scmp.lt.u32.totalorder %s610_s9, %s919_s1 }
   0x7   :  { %p616_p2 = pnand %p614_p1, %p611_p0 }
   0x9   :  { %619 = shalt.err (!%p616_p2)
}
   0xa   :  { %s620_s14 = scalar_lea.vmem %s33_s28, 128  ;;  %p625_p4 = scmp.lt.s32.totalorder %s33_s28, %s33_s28 }
   0xb   :  { %p621_p3 = scmp.ne.s32.totalorder %s33_s28, %s620_s14  ;;  %p626_p5 = scmp.lt.s32.totalorder %s620_s14, %s620_s14 }
   0xd   :  { %p627_p6 = por %p626_p5, %p625_p4 }
   0xf   :  { %p628_p7 = pnand %p627_p6, %p621_p3 }
  0x11   :  { %631 = shalt.err (!%p628_p7)
}
  0x12   :  { %s729_s15 = smov 64   ;;  %s730_s16 = smov 4  }
  0x13   :  { %38 = dma.hbm_to_vmem [thread:$0]  %s919_s1, 128, %s33_s28, [#allocation6], %s729_s15, %s729_s15, %s730_s16  }
  0x14   :  { %s731_s19 = smov [#allocation2]   ;;  %s732_s21 = smov [#allocation7]  }
  0x15   :  { %s23_s20 = sshll.u32 %s731_s19, 4  ;;  %s44_s22 = sshll.u32 %s732_s21, 4  ;;  %s24_s20 = int_to_ptr.vmem [resolvable:$true] %s23_s20  ;;  %s45_s22 = int_to_ptr.vmem [resolvable:$true] %s44_s22 }
  0x16   :  { %s632_s25 = scalar_lea.hbm %s918_s0, 128 }
  0x17   :  { %p633_p8 = scmp.ne.s32.totalorder %s918_s0, %s632_s25  ;;  %p636_p9 = scmp.lt.u32.totalorder %s632_s25, %s918_s0 }
  0x19   :  { %p638_p10 = pnand %p636_p9, %p633_p8 }
  0x1b   :  { %641 = shalt.err (!%p638_p10)
}
  0x1c   :  { %s642_s1 = scalar_lea.vmem %s24_s20, 128  ;;  %p647_p12 = scmp.lt.s32.totalorder %s24_s20, %s24_s20 }
  0x1d   :  { %p643_p11 = scmp.ne.s32.totalorder %s24_s20, %s642_s1  ;;  %p648_p13 = scmp.lt.s32.totalorder %s642_s1, %s642_s1 }
  0x1f   :  { %p649_p0 = por %p648_p13, %p647_p12 }
  0x21   :  { %p650_p1 = pnand %p649_p0, %p643_p11 }
  0x23   :  { %653 = shalt.err (!%p650_p1)
}
  0x24   :  { %26 = dma.hbm_to_vmem [thread:$0]  %s918_s0, 128, %s24_s20, [#allocation3]  }
  0x25   :  { %s654_s12 = scalar_lea.hbm %s920_s2, 256 }
  0x26   :  { %p655_p2 = scmp.ne.s32.totalorder %s920_s2, %s654_s12  ;;  %p658_p3 = scmp.lt.u32.totalorder %s654_s12, %s920_s2 }
  0x28   :  { %p660_p4 = pnand %p658_p3, %p655_p2 }
  0x2a   :  { %663 = shalt.err (!%p660_p4)
}
  0x2b   :  { %s664_s19 = scalar_lea.vmem %s45_s22, 256  ;;  %p669_p6 = scmp.lt.s32.totalorder %s45_s22, %s45_s22 }
  0x2c   :  { %p665_p5 = scmp.ne.s32.totalorder %s45_s22, %s664_s19  ;;  %p670_p7 = scmp.lt.s32.totalorder %s664_s19, %s664_s19 }
  0x2e   :  { %p671_p8 = por %p670_p7, %p669_p6 }
  0x30   :  { %p672_p9 = pnand %p671_p8, %p665_p5 }
  0x32   :  { %675 = shalt.err (!%p672_p9)
}
  0x33   :  { %50 = dma.hbm_to_vmem [thread:$0]  %s920_s2, 256, %s45_s22, [#allocation6], %s729_s15, %s729_s15, %s730_s16  }
  0x34   :  { %s733_s21 = smov [#allocation8]   ;;  %s676_s26 = scalar_lea.hbm %s922_s4, 256 }
  0x35   :  { %s58_s23 = sshll.u32 %s733_s21, 4  ;;  %p677_p10 = scmp.ne.s32.totalorder %s922_s4, %s676_s26  ;;  %s59_s23 = int_to_ptr.vmem [resolvable:$true] %s58_s23 }
  0x36   :  { %p680_p11 = scmp.lt.u32.totalorder %s676_s26, %s922_s4 }
  0x38   :  { %p682_p12 = pnand %p680_p11, %p677_p10 }
  0x3a   :  { %685 = shalt.err (!%p682_p12)
}
  0x3b   :  { %s686_s28 = scalar_lea.vmem %s59_s23, 256  ;;  %p691_p0 = scmp.lt.s32.totalorder %s59_s23, %s59_s23 }
  0x3c   :  { %p687_p13 = scmp.ne.s32.totalorder %s59_s23, %s686_s28  ;;  %p692_p1 = scmp.lt.s32.totalorder %s686_s28, %s686_s28 }
  0x3e   :  { %p693_p2 = por %p692_p1, %p691_p0 }
  0x40   :  { %p694_p3 = pnand %p693_p2, %p687_p13 }
  0x42   :  { %697 = shalt.err (!%p694_p3)
}
  0x43   :  { %64 = dma.hbm_to_vmem [thread:$0]  %s922_s4, 256, %s59_s23, [#allocation9], %s729_s15, %s729_s15, %s730_s16  }
  0x44   :  { %720 = dma.done.wait [#allocation3], 128  }
  0x45   :  { %721 = vsyncadd [#allocation3], 4294967168 }
  0x46   :  { %722 = dma.done.wait [#allocation6], 384  }
  0x47   :  { %723 = vsyncadd [#allocation6], 4294966912 }
  0x48   :  { %724 = dma.done.wait [#allocation9], 256  }
  0x49   :  { %725 = vsyncadd [#allocation9], 4294967040  ;;  %v734_v0 = vmov 0.0   ;;  %vm735_vm0 = vmmov 0   ;;  %v597_v1 = vld [vmem:[#allocation5] sm:$0xff]   ;;  %v84_v2 = vld [vmem:[#allocation2] sm:$0xff]  ;;  %v173_v33 = vlaneseq }
  0x4a   :  { %560 = vmatprep.subr.bf16.mxu0 %v734_v0  ;;  %562 = vmatprep.mubr.msk.bf16.mxu0 %vm735_vm0, %v734_v0  ;;  %vm101_vm1 = vcmask 130048   ;;  %v85_v3 = vpack.c.bf16 %v84_v2, %v84_v2  ;;  %v598_v4 = vld [vmem:[#allocation7] sm:$0xff]   ;;  %v599_v5 = vld [vmem:[#allocation7 + $0x8] sm:$0xff]   ;;  %v528_v6 = vld [vmem:[%s923_s5] ss:$0 sm:$0xff]  ;;  %vm211_vm2 = vcmask 261120  }
  0x4b   :  { %566 = vmatprep.subr.bf16.mxu1 %v734_v0  ;;  %570 = vmatprep.mubr.msk.bf16.mxu1 %vm735_vm0, %v734_v0  ;;  %v174_v34 = vshrl.u32 %v173_v33, 7  ;;  %v165_v35 = vld [vmem:[%s924_s6] sm:$0x1]  ;;  %vm312_vm3 = vcmask 1043456   ;;  %v532_v49 = vld [vmem:[%s923_s5 + $0x1] ss:$0 sm:$0xff] }
  0x4c   :  { %561 = vmatpush3.bf16.msra.mxu0 %v597_v1  ;;  %567 = vmatpush3.bf16.msra.mxu1 %v598_v4  ;;  %v169_v39 = vld [vmem:[%s925_s7] sm:$0x1]  ;;  %vm308_vm4 = vcmask 64512   ;;  %s736_s2 = smov [#allocation10]  }
  0x4d   :  { %574 = vmatprep.subr.bf16.mxu0 %v734_v0  ;;  %568 = vmatprep.subr.bf16.mxu1 %v734_v0  ;;  %v857_v36 = vsub.s32 0, %v174_v34  ;;  %v299_v47 = vld [vmem:[%s921_s3] sm:$0xf]  ;;  %s517_s22 = sshll.u32 %s736_s2, 4  ;;  %s518_s22 = int_to_ptr.vmem [resolvable:$true] %s517_s22 }
  0x4e   :  { %v314_v48 = vsel %vm312_vm3, %v299_v47, 0  ;;  %p703_p5 = scmp.lt.s32.totalorder %s518_s22, %s518_s22 }
  0x4f   :  { %563 = vmatmul.mubr.msk.bf16.vlgmr.msra.gmra.mrb[0].mxu0 %vm101_vm1, %v85_v3 }
  0x50   :  { %576 = vmatprep.mubr.msk.bf16.mxu0 %vm735_vm0, %v734_v0  ;;  %569 = vmatpush3.bf16.msra.mxu1 %v599_v5 }
  0x51   :  { %580 = vmatprep.subr.bf16.mxu1 %v734_v0  ;;  %575 = vmatpush3.bf16.msra.mxu0 %v314_v48 }
 0x122   :  { %v139_v7 = vpop.f32.mrb[0].mxu0 }
 0x123   :  { %v140_v8 = vadd.f32 %v528_v6, %v139_v7  ;;  %v564_v9 = vpop.f32.mrb[1].mxu0 }
 0x124   :  { %v142_v10 = vpop.f32.mrb[2].mxu0 }
 0x125   :  { %v145_v11 = vmul.f32 0.2, %v140_v8  ;;  %v565_v12 = vpop.f32.mrb[3].mxu0 }
 0x127   :  { %v146_v13 = vmax.f32 %v140_v8, %v145_v11 }
 0x129   :  { %v147_v14 = vrot.slane %v146_v13, 4  ;;  %v154_v15 = vmul.f32 %v146_v13, %v146_v13 }
 0x12b   :  { %v148_v16 = vadd.f32 %v147_v14, %v146_v13  ;;  %v155_v17 = vrot.slane %v154_v15, 4 }
 0x12d   :  { %v149_v18 = vrot.slane %v148_v16, 2  ;;  %v156_v19 = vadd.f32 %v155_v17, %v154_v15 }
 0x12f   :  { %v150_v20 = vadd.f32 %v149_v18, %v148_v16  ;;  %v157_v21 = vrot.slane %v156_v19, 2  ;;  %v537_v16 = vld [vmem:[%s925_s7 + $0x1] sm:$0x1] }
 0x131   :  { %v151_v22 = vrot.slane %v150_v20, 1  ;;  %v158_v23 = vadd.f32 %v157_v21, %v156_v19 }
 0x133   :  { %v152_v24 = vadd.f32 %v151_v22, %v150_v20  ;;  %v159_v25 = vrot.slane %v158_v23, 1 }
 0x135   :  { %v153_v26 = vmul.f32 0.125, %v152_v24  ;;  %v160_v27 = vadd.f32 %v159_v25, %v158_v23  ;;  %v600_v24 = vld [vmem:[#allocation8] sm:$0xff]   ;;  %v601_v25 = vld [vmem:[#allocation8 + $0x8] sm:$0xff]  }
 0x137   :  { %v161_v28 = vmul.f32 0.125, %v160_v27  ;;  %v162_v29 = vmul.f32 %v153_v26, %v153_v26 }
 0x139   :  { %v163_v30 = vsub.f32 %v161_v28, %v162_v29 }
 0x13b   :  { %v164_v31 = vmax.f32 %v163_v30, 0.0 }
 0x13d   :  { %v166_v32 = vadd.f32 1e-05, %v164_v31 }
 0x13f   :  { %602 = vrsqrt.f32 %v166_v32 }
 0x149   :  { %v603_v37 = vpop.eup %602 }
 0x14a   :  { %v168_v38 = vmul.f32 %v603_v37, %v165_v35 }
 0x14c   :  { %v170_v40 = vmul.f32 %v168_v38, %v153_v26  ;;  %v176_v41 = vrot.slane %v168_v38, %v857_v36  ;;  %v539_v26 = vld [vmem:[%s923_s5 + $0x2] ss:$0 sm:$0xff] }
 0x14e   :  { %v171_v42 = vsub.f32 %v169_v39, %v170_v40  ;;  %v178_v43 = vmul.f32 %v176_v41, %v146_v13  ;;  %v536_v13 = vld [vmem:[%s924_s6 + $0x1] sm:$0x1] }
 0x150   :  { %v183_v44 = vrot.slane %v171_v42, %v857_v36 }
 0x152   :  { %v185_v45 = vadd.f32 %v183_v44, %v178_v43 }
 0x154   :  { %v186_v46 = vpack.c.bf16 %v185_v45, %v185_v45 }
 0x156   :  { %571 = vmatmul.mubr.msk.bf16.vlgmr.msra.gmra.mrb[0].mxu1 %vm211_vm2, %v186_v46 }
 0x157   :  { %584 = vmatprep.mubr.msk.bf16.mxu1 %vm735_vm0, %v734_v0  ;;  %581 = vmatpush3.bf16.msra.mxu1 %v600_v24 }
 0x158   :  { %582 = vmatprep.subr.bf16.mxu1 %v734_v0 }
 0x15b   :  { %583 = vmatpush3.bf16.msra.mxu1 %v601_v25 }
 0x229   :  { %v249_v50 = vpop.f32.mrb[0].mxu1 }
 0x22a   :  { %v250_v51 = vadd.f32 %v532_v49, %v249_v50  ;;  %v572_v52 = vpop.f32.mrb[1].mxu1 }
 0x22b   :  { %v252_v53 = vpop.f32.mrb[2].mxu1 }
 0x22c   :  { %v255_v54 = vmul.f32 0.2, %v250_v51  ;;  %v573_v55 = vpop.f32.mrb[3].mxu1  ;;  %v541_v53 = vld [vmem:[%s924_s6 + $0x2] sm:$0x1] }
 0x22e   :  { %v256_v56 = vmax.f32 %v250_v51, %v255_v54 }
 0x230   :  { %v257_v57 = vrot.slane %v256_v56, 4  ;;  %v264_v58 = vmul.f32 %v256_v56, %v256_v56 }
 0x232   :  { %v258_v59 = vadd.f32 %v257_v57, %v256_v56  ;;  %v265_v60 = vrot.slane %v264_v58, 4 }
 0x234   :  { %v259_v61 = vrot.slane %v258_v59, 2  ;;  %v266_v62 = vadd.f32 %v265_v60, %v264_v58 }
 0x236   :  { %v260_v63 = vadd.f32 %v259_v61, %v258_v59  ;;  %v267_v1 = vrot.slane %v266_v62, 2 }
 0x238   :  { %v261_v2 = vrot.slane %v260_v63, 1  ;;  %v268_v3 = vadd.f32 %v267_v1, %v266_v62  ;;  %v544_v1 = vld [vmem:[%s923_s5 + $0x3] ss:$0 sm:$0xff] }
 0x23a   :  { %v262_v4 = vadd.f32 %v261_v2, %v260_v63  ;;  %v269_v5 = vrot.slane %v268_v3, 1 }
 0x23c   :  { %v263_v6 = vmul.f32 0.125, %v262_v4  ;;  %v270_v7 = vadd.f32 %v269_v5, %v268_v3 }
 0x23e   :  { %v271_v8 = vmul.f32 0.125, %v270_v7  ;;  %v272_v9 = vmul.f32 %v263_v6, %v263_v6 }
 0x240   :  { %v273_v10 = vsub.f32 %v271_v8, %v272_v9 }
 0x242   :  { %v274_v11 = vmax.f32 %v273_v10, 0.0 }
 0x244   :  { %v277_v12 = vadd.f32 1e-05, %v274_v11 }
 0x246   :  { %604 = vrsqrt.f32 %v277_v12 }
 0x250   :  { %v605_v14 = vpop.eup %604 }
 0x251   :  { %v279_v15 = vmul.f32 %v605_v14, %v536_v13 }
 0x253   :  { %v282_v17 = vmul.f32 %v279_v15, %v263_v6  ;;  %v288_v18 = vrot.slane %v279_v15, %v857_v36 }
 0x255   :  { %v283_v19 = vsub.f32 %v537_v16, %v282_v17  ;;  %v290_v20 = vmul.f32 %v288_v18, %v256_v56  ;;  %v542_v56 = vld [vmem:[%s925_s7 + $0x2] sm:$0x1] }
 0x257   :  { %v295_v21 = vrot.slane %v283_v19, %v857_v36 }
 0x259   :  { %v297_v22 = vadd.f32 %v295_v21, %v290_v20 }
 0x25b   :  { %v298_v23 = vpack.c.bf16 %v297_v22, %v297_v22 }
 0x25d   :  { %577 = vmatmul.mubr.msk.bf16.vlgmr.msra.gmra.mrb[4].mxu0 %vm308_vm4, %v298_v23 }
 0x330   :  { %v350_v27 = vpop.f32.mrb[4].mxu0 }
 0x331   :  { %v351_v28 = vadd.f32 %v539_v26, %v350_v27  ;;  %v578_v29 = vpop.f32.mrb[5].mxu0 }
 0x332   :  { %v353_v30 = vpop.f32.mrb[6].mxu0 }
 0x333   :  { %v356_v31 = vmul.f32 0.2, %v351_v28  ;;  %v579_v32 = vpop.f32.mrb[7].mxu0 }
 0x335   :  { %v357_v33 = vmax.f32 %v351_v28, %v356_v31  ;;  %v548_v28 = vld [vmem:[%s924_s6 + $0x3] sm:$0x1]  ;;  %s698_s6 = scalar_lea.vmem %s518_s22, 128 }
 0x336   :  { %v549_v31 = vld [vmem:[%s925_s7 + $0x3] sm:$0x1]  ;;  %p699_p4 = scmp.ne.s32.totalorder %s518_s22, %s698_s6  ;;  %p704_p6 = scmp.lt.s32.totalorder %s698_s6, %s698_s6 }
 0x337   :  { %v358_v34 = vrot.slane %v357_v33, 4  ;;  %v365_v35 = vmul.f32 %v357_v33, %v357_v33 }
 0x338   :  { %p705_p7 = por %p704_p6, %p703_p5 }
 0x339   :  { %v359_v37 = vadd.f32 %v358_v34, %v357_v33  ;;  %v366_v38 = vrot.slane %v365_v35, 4 }
 0x33a   :  { %p706_p8 = pnand %p705_p7, %p699_p4 }
 0x33b   :  { %v360_v39 = vrot.slane %v359_v37, 2  ;;  %v367_v40 = vadd.f32 %v366_v38, %v365_v35 }
 0x33d   :  { %v361_v41 = vadd.f32 %v360_v39, %v359_v37  ;;  %v368_v0 = vrot.slane %v367_v40, 2 }
 0x33f   :  { %v362_v42 = vrot.slane %v361_v41, 1  ;;  %v369_v43 = vadd.f32 %v368_v0, %v367_v40 }
 0x341   :  { %v363_v44 = vadd.f32 %v362_v42, %v361_v41  ;;  %v370_v45 = vrot.slane %v369_v43, 1 }
 0x343   :  { %v364_v46 = vmul.f32 0.125, %v363_v44  ;;  %v371_v47 = vadd.f32 %v370_v45, %v369_v43 }
 0x345   :  { %v372_v48 = vmul.f32 0.125, %v371_v47  ;;  %v373_v49 = vmul.f32 %v364_v46, %v364_v46 }
 0x347   :  { %v374_v50 = vsub.f32 %v372_v48, %v373_v49 }
 0x349   :  { %v375_v51 = vmax.f32 %v374_v50, 0.0 }
 0x34b   :  { %v378_v52 = vadd.f32 1e-05, %v375_v51 }
 0x34d   :  { %606 = vrsqrt.f32 %v378_v52 }
 0x357   :  { %v607_v54 = vpop.eup %606 }
 0x358   :  { %v380_v55 = vmul.f32 %v607_v54, %v541_v53 }
 0x35a   :  { %v383_v57 = vmul.f32 %v380_v55, %v364_v46  ;;  %v389_v58 = vrot.slane %v380_v55, %v857_v36 }
 0x35c   :  { %v384_v59 = vsub.f32 %v542_v56, %v383_v57  ;;  %v391_v60 = vmul.f32 %v389_v58, %v357_v33 }
 0x35e   :  { %v396_v61 = vrot.slane %v384_v59, %v857_v36 }
 0x360   :  { %v398_v62 = vadd.f32 %v396_v61, %v391_v60 }
 0x362   :  { %v399_v63 = vpack.c.bf16 %v398_v62, %v398_v62 }
 0x364   :  { %585 = vmatmul.mubr.msk.bf16.vlgmr.msra.gmra.mrb[4].mxu1 %vm211_vm2, %v399_v63 }
 0x437   :  { %v461_v2 = vpop.f32.mrb[4].mxu1 }
 0x438   :  { %v462_v3 = vadd.f32 %v544_v1, %v461_v2  ;;  %v586_v4 = vpop.f32.mrb[5].mxu1 }
 0x439   :  { %v464_v5 = vpop.f32.mrb[6].mxu1 }
 0x43a   :  { %v467_v6 = vmul.f32 0.2, %v462_v3  ;;  %v587_v7 = vpop.f32.mrb[7].mxu1 }
 0x43c   :  { %v468_v8 = vmax.f32 %v462_v3, %v467_v6 }
 0x43e   :  { %v469_v9 = vrot.slane %v468_v8, 4  ;;  %v476_v10 = vmul.f32 %v468_v8, %v468_v8 }
 0x440   :  { %v470_v11 = vadd.f32 %v469_v9, %v468_v8  ;;  %v477_v12 = vrot.slane %v476_v10, 4 }
 0x442   :  { %v471_v13 = vrot.slane %v470_v11, 2  ;;  %v478_v14 = vadd.f32 %v477_v12, %v476_v10 }
 0x444   :  { %v472_v15 = vadd.f32 %v471_v13, %v470_v11  ;;  %v479_v16 = vrot.slane %v478_v14, 2 }
 0x446   :  { %v473_v17 = vrot.slane %v472_v15, 1  ;;  %v480_v18 = vadd.f32 %v479_v16, %v478_v14 }
 0x448   :  { %v474_v19 = vadd.f32 %v473_v17, %v472_v15  ;;  %v481_v20 = vrot.slane %v480_v18, 1 }
 0x44a   :  { %v482_v21 = vadd.f32 %v481_v20, %v480_v18  ;;  %v475_v22 = vmul.f32 0.125, %v474_v19 }
 0x44c   :  { %v483_v23 = vmul.f32 0.125, %v482_v21  ;;  %v484_v24 = vmul.f32 %v475_v22, %v475_v22 }
 0x44e   :  { %v485_v25 = vsub.f32 %v483_v23, %v484_v24 }
 0x450   :  { %v486_v26 = vmax.f32 %v485_v25, 0.0 }
 0x452   :  { %v489_v27 = vadd.f32 1e-05, %v486_v26 }
 0x454   :  { %608 = vrsqrt.f32 %v489_v27 }
 0x45e   :  { %v609_v29 = vpop.eup %608 }
 0x45f   :  { %v491_v30 = vmul.f32 %v609_v29, %v548_v28 }
 0x461   :  { %v494_v32 = vmul.f32 %v491_v30, %v475_v22  ;;  %v500_v33 = vrot.slane %v491_v30, %v857_v36 }
 0x463   :  { %v495_v34 = vsub.f32 %v549_v31, %v494_v32  ;;  %v502_v35 = vmul.f32 %v500_v33, %v468_v8 }
 0x465   :  { %v507_v37 = vrot.slane %v495_v34, %v857_v36 }
 0x467   :  { %v509_v38 = vadd.f32 %v507_v37, %v502_v35 }
 0x469   :  { %510 = vst.msk [vmem:[#allocation10] sm:$0xff] %vm101_vm1, %v509_v38 }
 0x46a   :  { %709 = shalt.err (!%p706_p8)
}
 0x46b   :  { %s710_s15 = scalar_lea.hbm %s926_s8, 128 }
 0x46c   :  { %p711_p9 = scmp.ne.s32.totalorder %s926_s8, %s710_s15  ;;  %p714_p10 = scmp.lt.u32.totalorder %s710_s15, %s926_s8 }
 0x46e   :  { %p716_p11 = pnand %p714_p10, %p711_p9 }
 0x470   :  { %719 = shalt.err (!%p716_p11)
}
 0x471   :  { %520 = dma.vmem_to_hbm [thread:$0]  %s518_s22, 128, %s926_s8, [#allocation4]  }
 0x472   :  { %726 = dma.done.wait [#allocation4], 128  }
 0x473   :  { %727 = vsyncadd [#allocation4], 4294967168 }
 0x474   :  { %524 = vsyncpa [#allocation3], 1 }
 0x475   :  { %525 = vsyncpa [#allocation6], 1 }
 0x476   :  { %526 = vsyncpa [#allocation9], 1 }
 0x477   :  { %527 = vsyncpa [#allocation4], 1 }

</bundles_post_ra>
